<compile_context>
chip_gen: v7x
topology: tpu7x:2x2x1
jax: 0.10.0
libtpu: 0.0.40
codegen_flags: <defaults>
</compile_context>

<pallas_src>
import jax
import jax.numpy as jnp
from jax import lax
from jax.experimental import pallas as pl
from jax.experimental.pallas import tpu as pltpu

# ---- model hyper-parameters (small, consistent with the module) -------------
NUM_NODES = 16      # synthetic small graph
IN_CH     = 5       # len(numeric_cols) == 5
HIDDEN    = 8       # hidden_channels
OUT_CH    = 4       # out_channels
HEADS     = 2       # heads for gat1 (gat2 uses heads=1)
NEG_SLOPE = 0.2     # GATConv LeakyReLU negative_slope default
HC1       = HEADS * HIDDEN            # 16

# ---- packed parameter slab layout (all row offsets 8-aligned) ----------------
P_COLS = 16
R_W1  = 0          # w1    [IN_CH, HC1]
R_B1  = 8          # b1    [1, HC1]
R_AS1 = 16         # Asrc1 [HEADS, HC1]   (row hd holds a_src_hd in its head's cols)
R_AD1 = 24         # Adst1 [HC1, HEADS]   (block-diag columns)
R_W2  = 40         # w2    [HC1, OUT_CH]
R_AS2 = 56         # Asrc2 [1, OUT_CH]
R_AD2 = 64         # Adst2 [OUT_CH, 1]
R_B2  = 72         # b2    [1, OUT_CH]
P_ROWS = 80

# ---- per-graph data slab layout ----------------------------------------------
R_X   = 0          # x   [NUM_NODES, IN_CH]
R_ADJ = 16         # adj [NUM_NODES, NUM_NODES]
D_ROWS = 32


def _gat_layer(x, penalty, W, Asrc, Adst, bias, heads, C):
    """Dense GATConv layer (concat over heads).

    x:       [N, F_in]
    penalty: [N, N] additive mask, 0 where edge j->i exists (incl. self loop), -1e30 otherwise
    W:       [F_in, heads*C]
    Asrc:    [heads, heads*C]  row hd = a_src_hd placed in columns hd*C..(hd+1)*C
    Adst:    [heads*C, heads]  column hd = a_dst_hd placed in rows hd*C..(hd+1)*C
    bias:    [1, heads*C]
    """
    h_all = jnp.dot(x, W, preferred_element_type=jnp.float32)          # [N, heads*C]
    e_dst = jnp.dot(h_all, Adst, preferred_element_type=jnp.float32)   # [N, heads]
    # Source logits as rows, no transpose: contract the channel axis of h_all on the MXU.
    e_src = lax.dot_general(Asrc, h_all, (((1,), (1,)), ((), ())),
                            preferred_element_type=jnp.float32)        # [heads, N]

    outs = []
    for hd in range(heads):
        logit = e_dst[:, hd:hd + 1] + e_src[hd:hd + 1, :]              # [N, N]
        logit = jnp.where(logit > 0, logit, NEG_SLOPE * logit)         # LeakyReLU
        logit = logit + penalty                                        # off-edge -> -1e30
        m = jnp.max(logit, axis=1, keepdims=True)                      # per-head row max (finite: self loops)
        p = jnp.exp(logit - m)                                         # masked entries underflow to exactly 0
        denom = jnp.maximum(jnp.sum(p, axis=1, keepdims=True), 1e-20)
        h_h = h_all[:, hd * C:(hd + 1) * C]                            # [N, C]
        acc = jnp.dot(p, h_h, preferred_element_type=jnp.float32)      # [N, C]
        outs.append(acc * pl.reciprocal(denom, approx=False))          # exact reciprocal (parity w/ torch)
    out = outs[0] if heads == 1 else jnp.concatenate(outs, axis=-1)
    return out + bias                                                  # [N, heads*C]


def gat_encoder_kernel(prm_ref, data_ref, out_ref):
    prm = prm_ref[...]                                                 # [P_ROWS, P_COLS]
    x   = data_ref[R_X:R_X + NUM_NODES, 0:IN_CH]                       # [N, IN_CH]
    adj = data_ref[R_ADJ:R_ADJ + NUM_NODES, 0:NUM_NODES]               # [N, N]
    penalty = jnp.where(adj > 0.0, 0.0, -1e30).astype(jnp.float32)     # single shared mask penalty

    w1    = prm[R_W1:R_W1 + IN_CH, 0:HC1]
    b1    = prm[R_B1:R_B1 + 1, 0:HC1]
    asrc1 = prm[R_AS1:R_AS1 + HEADS, 0:HC1]
    adst1 = prm[R_AD1:R_AD1 + HC1, 0:HEADS]
    w2    = prm[R_W2:R_W2 + HC1, 0:OUT_CH]
    asrc2 = prm[R_AS2:R_AS2 + 1, 0:OUT_CH]
    adst2 = prm[R_AD2:R_AD2 + OUT_CH, 0:1]
    b2    = prm[R_B2:R_B2 + 1, 0:OUT_CH]

    # layer 1: GATConv(IN_CH, HIDDEN, heads=HEADS), concat -> [N, HEADS*HIDDEN]
    h1 = _gat_layer(x, penalty, w1, asrc1, adst1, b1, HEADS, HIDDEN)
    # F.elu
    h1 = jnp.where(h1 > 0, h1, jnp.exp(jnp.minimum(h1, 0.0)) - 1.0)

    # layer 2: GATConv(HEADS*HIDDEN, OUT_CH, heads=1) -> [N, OUT_CH]
    h2 = _gat_layer(h1, penalty, w2, asrc2, adst2, b2, 1, OUT_CH)
    out_ref[...] = h2


def gat_encoder(params_slab, data_slab):
    """params_slab: [P_ROWS, P_COLS] f32 (shared); data_slab: [B, D_ROWS, P_COLS] f32."""
    B = data_slab.shape[0]
    flops_per_graph = (2 * NUM_NODES * NUM_NODES * (HC1 + OUT_CH)
                       + 2 * NUM_NODES * (IN_CH * HC1 + HC1 * 2 * HEADS
                                          + HC1 * OUT_CH + OUT_CH * 2))
    cost = pl.CostEstimate(
        flops=B * flops_per_graph,
        transcendentals=B * NUM_NODES * ((HEADS + 1) * NUM_NODES + HC1),
        bytes_accessed=4 * (P_ROWS * P_COLS
                            + B * (D_ROWS * P_COLS + NUM_NODES * OUT_CH)),
    )
    return pl.pallas_call(
        gat_encoder_kernel,
        out_shape=jax.ShapeDtypeStruct((B, NUM_NODES, OUT_CH), jnp.float32),
        grid=(B,),
        in_specs=[
            # shared parameter slab: constant block index -> fetched once, stays resident
            pl.BlockSpec((P_ROWS, P_COLS), lambda b: (0, 0)),
            # one graph (x + adj packed) per grid step
            pl.BlockSpec((None, D_ROWS, P_COLS), lambda b: (b, 0, 0)),
        ],
        out_specs=pl.BlockSpec((None, NUM_NODES, OUT_CH), lambda b: (b, 0, 0)),
        compiler_params=pltpu.CompilerParams(dimension_semantics=("parallel",)),
        cost_estimate=cost,
    )(params_slab, data_slab)


def build_dense_adj(edge_index, num_nodes):
    """edge_index: [2, E] (row 0 = source, row 1 = target). Adds self loops."""
    src, dst = edge_index[0], edge_index[1]
    adj = jnp.zeros((num_nodes, num_nodes), jnp.float32)
    adj = adj.at[dst, src].set(1.0)                 # adj[i, j] = 1 <=> edge j -> i
    diag = jnp.arange(num_nodes)
    adj = adj.at[diag, diag].set(1.0)               # add_self_loops=True
    return adj


def init_params(key):
    ks = jax.random.split(key, 8)
    s = 0.1
    w1  = s * jax.random.normal(ks[0], (IN_CH, HC1), jnp.float32)
    as1 = s * jax.random.normal(ks[1], (HEADS, HIDDEN), jnp.float32)
    ad1 = s * jax.random.normal(ks[2], (HEADS, HIDDEN), jnp.float32)
    b1  = s * jax.random.normal(ks[3], (1, HC1), jnp.float32)
    w2  = s * jax.random.normal(ks[4], (HC1, OUT_CH), jnp.float32)
    as2 = s * jax.random.normal(ks[5], (1, OUT_CH), jnp.float32)
    ad2 = s * jax.random.normal(ks[6], (1, OUT_CH), jnp.float32)
    b2  = s * jax.random.normal(ks[7], (1, OUT_CH), jnp.float32)
    return (w1, as1, ad1, b1, w2, as2, ad2, b2)


def pack_params(params):
    """Pack all 8 parameter tensors into one 8-row-aligned [P_ROWS, P_COLS] f32 slab."""
    (w1, as1, ad1, b1, w2, as2, ad2, b2) = params
    asrc1 = jnp.zeros((HEADS, HC1), jnp.float32)
    adst1 = jnp.zeros((HC1, HEADS), jnp.float32)
    for hd in range(HEADS):
        asrc1 = asrc1.at[hd, hd * HIDDEN:(hd + 1) * HIDDEN].set(as1[hd])
        adst1 = adst1.at[hd * HIDDEN:(hd + 1) * HIDDEN, hd].set(ad1[hd])
    asrc2 = as2                                     # [1, OUT_CH]
    adst2 = ad2.T                                   # [OUT_CH, 1]

    slab = jnp.zeros((P_ROWS, P_COLS), jnp.float32)
    slab = slab.at[R_W1:R_W1 + IN_CH, 0:HC1].set(w1)
    slab = slab.at[R_B1:R_B1 + 1, 0:HC1].set(b1)
    slab = slab.at[R_AS1:R_AS1 + HEADS, 0:HC1].set(asrc1)
    slab = slab.at[R_AD1:R_AD1 + HC1, 0:HEADS].set(adst1)
    slab = slab.at[R_W2:R_W2 + HC1, 0:OUT_CH].set(w2)
    slab = slab.at[R_AS2:R_AS2 + 1, 0:OUT_CH].set(asrc2)
    slab = slab.at[R_AD2:R_AD2 + OUT_CH, 0:1].set(adst2)
    slab = slab.at[R_B2:R_B2 + 1, 0:OUT_CH].set(b2)
    return slab


def pack_data(x, adj):
    """Pack per-graph x ([B,N,IN_CH]) and adj ([B,N,N]) into one [B, D_ROWS, P_COLS] slab."""
    B = x.shape[0]
    slab = jnp.zeros((B, D_ROWS, P_COLS), jnp.float32)
    slab = slab.at[:, R_X:R_X + NUM_NODES, 0:IN_CH].set(x)
    slab = slab.at[:, R_ADJ:R_ADJ + NUM_NODES, 0:NUM_NODES].set(adj)
    return slab


if __name__ == "__main__":
    B = 4                                   # batch of graphs per call (parallel grid axis)
    key = jax.random.PRNGKey(0)
    k_x, k_e, k_p = jax.random.split(key, 3)

    # node features (synthetic stand-in for the 5 numeric transaction columns)
    x = jax.random.normal(k_x, (B, NUM_NODES, IN_CH), jnp.float32)

    # deterministic synthetic edge_index per graph, [2, E]
    num_edges = 40
    edge_index = jax.random.randint(k_e, (B, 2, num_edges), 0, NUM_NODES)
    adj = jnp.stack([build_dense_adj(edge_index[b], NUM_NODES) for b in range(B)])

    params_slab = pack_params(init_params(k_p))
    data_slab = pack_data(x, adj)

    out = gat_encoder(params_slab, data_slab)
    out = jax.block_until_ready(out)
    assert out.shape == (B, NUM_NODES, OUT_CH)
    assert bool(jnp.all(jnp.isfinite(out)))
    print("KERNEL_OK")
</pallas_src>

<mosaic_0001>
module attributes {stable_mosaic.version = 11 : i64} {
  func.func @gat_encoder_kernel(%arg0: i32, %arg1: memref<80x16xf32, #tpu.memory_space<vmem>>, %arg2: memref<1x32x16xf32, #tpu.memory_space<vmem>>, %arg3: memref<1x16x4xf32, #tpu.memory_space<vmem>>) attributes {dimension_semantics = [#tpu.dimension_semantics<parallel>], iteration_bounds = array<i64: 4>, scalar_prefetch = 0 : i64, scratch_operands = 0 : i64, tpu.core_type = #tpu.core_type<tc>, window_params = [{pipeline_mode = #tpu.pipeline_mode<synchronous>, transform_indices = @transform_0, window_bounds = array<i64: 80, 16>}, {transform_indices = @transform_1, window_bounds = array<i64: 1, 32, 16>}, {transform_indices = @transform_2, window_bounds = array<i64: 1, 16, 4>}]} {
    %c0 = arith.constant 0 : index
    %c0_0 = arith.constant 0 : index
    %0 = vector.load %arg1[%c0, %c0_0] : memref<80x16xf32, #tpu.memory_space<vmem>>, vector<80x16xf32>
    %c0_1 = arith.constant 0 : index
    %c0_2 = arith.constant 0 : index
    %c0_3 = arith.constant 0 : index
    %1 = vector.load %arg2[%c0_1, %c0_2, %c0_3] : memref<1x32x16xf32, #tpu.memory_space<vmem>>, vector<1x16x5xf32>
    %2 = vector.shape_cast %1 : vector<1x16x5xf32> to vector<16x5xf32>
    %c0_4 = arith.constant 0 : index
    %c16 = arith.constant 16 : index
    %c0_5 = arith.constant 0 : index
    %3 = vector.load %arg2[%c0_4, %c16, %c0_5] : memref<1x32x16xf32, #tpu.memory_space<vmem>>, vector<1x16x16xf32>
    %4 = vector.shape_cast %3 : vector<1x16x16xf32> to vector<16x16xf32>
    %cst = arith.constant 0.000000e+00 : f32
    %5 = vector.broadcast %cst : f32 to vector<16x16xf32>
    %6 = arith.cmpf ogt, %4, %5 : vector<16x16xf32>
    %cst_6 = arith.constant 0.000000e+00 : f32
    %cst_7 = arith.constant -1.000000e+30 : f32
    %7 = vector.broadcast %cst_6 : f32 to vector<16x16xf32>
    %8 = vector.broadcast %cst_7 : f32 to vector<16x16xf32>
    %9 = arith.select %6, %7, %8 : vector<16x16xi1>, vector<16x16xf32>
    %10 = vector.extract_strided_slice %0 {offsets = [0, 0], sizes = [5, 16], strides = [1, 1]} : vector<80x16xf32> to vector<5x16xf32>
    %11 = vector.extract_strided_slice %0 {offsets = [8, 0], sizes = [1, 16], strides = [1, 1]} : vector<80x16xf32> to vector<1x16xf32>
    %12 = vector.extract_strided_slice %0 {offsets = [16, 0], sizes = [2, 16], strides = [1, 1]} : vector<80x16xf32> to vector<2x16xf32>
    %13 = vector.extract_strided_slice %0 {offsets = [24, 0], sizes = [16, 2], strides = [1, 1]} : vector<80x16xf32> to vector<16x2xf32>
    %14 = vector.extract_strided_slice %0 {offsets = [40, 0], sizes = [16, 4], strides = [1, 1]} : vector<80x16xf32> to vector<16x4xf32>
    %15 = vector.extract_strided_slice %0 {offsets = [56, 0], sizes = [1, 4], strides = [1, 1]} : vector<80x16xf32> to vector<1x4xf32>
    %16 = vector.extract_strided_slice %0 {offsets = [64, 0], sizes = [4, 1], strides = [1, 1]} : vector<80x16xf32> to vector<4x1xf32>
    %17 = vector.extract_strided_slice %0 {offsets = [72, 0], sizes = [1, 4], strides = [1, 1]} : vector<80x16xf32> to vector<1x4xf32>
    %cst_8 = arith.constant dense<0.000000e+00> : vector<16x16xf32>
    %18 = tpu.matmul %2, %10, %cst_8 {dimension_numbers = #tpu.dot_dimension_numbers<[1], [0], [0], [1], [0, 0, 1, 1], [], []>} : vector<16x5xf32>, vector<5x16xf32>, vector<16x16xf32> -> vector<16x16xf32>
    %cst_9 = arith.constant dense<0.000000e+00> : vector<16x2xf32>
    %19 = tpu.matmul %18, %13, %cst_9 {dimension_numbers = #tpu.dot_dimension_numbers<[1], [0], [0], [1], [0, 0, 1, 1], [], []>} : vector<16x16xf32>, vector<16x2xf32>, vector<16x2xf32> -> vector<16x2xf32>
    %cst_10 = arith.constant dense<0.000000e+00> : vector<2x16xf32>
    %20 = tpu.matmul %12, %18, %cst_10 {dimension_numbers = #tpu.dot_dimension_numbers<[1], [1], [0], [0], [0, 0, 1, 0], [], []>} : vector<2x16xf32>, vector<16x16xf32>, vector<2x16xf32> -> vector<2x16xf32>
    %21 = vector.extract_strided_slice %19 {offsets = [0, 0], sizes = [16, 1], strides = [1, 1]} : vector<16x2xf32> to vector<16x1xf32>
    %22 = vector.extract_strided_slice %20 {offsets = [0, 0], sizes = [1, 16], strides = [1, 1]} : vector<2x16xf32> to vector<1x16xf32>
    %23 = vector.broadcast %21 : vector<16x1xf32> to vector<16x16xf32>
    %24 = vector.broadcast %22 : vector<1x16xf32> to vector<16x16xf32>
    %25 = arith.addf %23, %24 : vector<16x16xf32>
    %cst_11 = arith.constant 0.000000e+00 : f32
    %26 = vector.broadcast %cst_11 : f32 to vector<16x16xf32>
    %27 = arith.cmpf ogt, %25, %26 : vector<16x16xf32>
    %cst_12 = arith.constant 2.000000e-01 : f32
    %28 = vector.broadcast %cst_12 : f32 to vector<16x16xf32>
    %29 = arith.mulf %28, %25 : vector<16x16xf32>
    %30 = arith.select %27, %25, %29 : vector<16x16xi1>, vector<16x16xf32>
    %31 = arith.addf %30, %9 : vector<16x16xf32>
    %cst_13 = arith.constant dense<0xFF800000> : vector<16xf32>
    %32 = vector.multi_reduction <maximumf>, %31, %cst_13 [1] : vector<16x16xf32> to vector<16xf32>
    %33 = vector.shape_cast %32 : vector<16xf32> to vector<16x1xf32>
    %34 = vector.broadcast %33 : vector<16x1xf32> to vector<16x16xf32>
    %35 = arith.subf %31, %34 : vector<16x16xf32>
    %36 = math.exp %35 : vector<16x16xf32>
    %cst_14 = arith.constant dense<0.000000e+00> : vector<16xf32>
    %37 = vector.multi_reduction <add>, %36, %cst_14 [1] : vector<16x16xf32> to vector<16xf32>
    %38 = vector.shape_cast %37 : vector<16xf32> to vector<16x1xf32>
    %cst_15 = arith.constant 9.99999968E-21 : f32
    %39 = vector.broadcast %cst_15 : f32 to vector<16x1xf32>
    %40 = arith.maximumf %38, %39 : vector<16x1xf32>
    %41 = vector.extract_strided_slice %18 {offsets = [0, 0], sizes = [16, 8], strides = [1, 1]} : vector<16x16xf32> to vector<16x8xf32>
    %cst_16 = arith.constant dense<0.000000e+00> : vector<16x8xf32>
    %42 = tpu.matmul %36, %41, %cst_16 {dimension_numbers = #tpu.dot_dimension_numbers<[1], [0], [0], [1], [0, 0, 1, 1], [], []>} : vector<16x16xf32>, vector<16x8xf32>, vector<16x8xf32> -> vector<16x8xf32>
    %43 = tpu.reciprocal %40 : vector<16x1xf32> -> vector<16x1xf32>
    %44 = vector.broadcast %43 : vector<16x1xf32> to vector<16x8xf32>
    %45 = arith.mulf %42, %44 : vector<16x8xf32>
    %46 = vector.extract_strided_slice %19 {offsets = [0, 1], sizes = [16, 1], strides = [1, 1]} : vector<16x2xf32> to vector<16x1xf32>
    %47 = vector.extract_strided_slice %20 {offsets = [1, 0], sizes = [1, 16], strides = [1, 1]} : vector<2x16xf32> to vector<1x16xf32>
    %48 = vector.broadcast %46 : vector<16x1xf32> to vector<16x16xf32>
    %49 = vector.broadcast %47 : vector<1x16xf32> to vector<16x16xf32>
    %50 = arith.addf %48, %49 : vector<16x16xf32>
    %cst_17 = arith.constant 0.000000e+00 : f32
    %51 = vector.broadcast %cst_17 : f32 to vector<16x16xf32>
    %52 = arith.cmpf ogt, %50, %51 : vector<16x16xf32>
    %cst_18 = arith.constant 2.000000e-01 : f32
    %53 = vector.broadcast %cst_18 : f32 to vector<16x16xf32>
    %54 = arith.mulf %53, %50 : vector<16x16xf32>
    %55 = arith.select %52, %50, %54 : vector<16x16xi1>, vector<16x16xf32>
    %56 = arith.addf %55, %9 : vector<16x16xf32>
    %cst_19 = arith.constant dense<0xFF800000> : vector<16xf32>
    %57 = vector.multi_reduction <maximumf>, %56, %cst_19 [1] : vector<16x16xf32> to vector<16xf32>
    %58 = vector.shape_cast %57 : vector<16xf32> to vector<16x1xf32>
    %59 = vector.broadcast %58 : vector<16x1xf32> to vector<16x16xf32>
    %60 = arith.subf %56, %59 : vector<16x16xf32>
    %61 = math.exp %60 : vector<16x16xf32>
    %cst_20 = arith.constant dense<0.000000e+00> : vector<16xf32>
    %62 = vector.multi_reduction <add>, %61, %cst_20 [1] : vector<16x16xf32> to vector<16xf32>
    %63 = vector.shape_cast %62 : vector<16xf32> to vector<16x1xf32>
    %cst_21 = arith.constant 9.99999968E-21 : f32
    %64 = vector.broadcast %cst_21 : f32 to vector<16x1xf32>
    %65 = arith.maximumf %63, %64 : vector<16x1xf32>
    %66 = vector.extract_strided_slice %18 {offsets = [0, 8], sizes = [16, 8], strides = [1, 1]} : vector<16x16xf32> to vector<16x8xf32>
    %cst_22 = arith.constant dense<0.000000e+00> : vector<16x8xf32>
    %67 = tpu.matmul %61, %66, %cst_22 {dimension_numbers = #tpu.dot_dimension_numbers<[1], [0], [0], [1], [0, 0, 1, 1], [], []>} : vector<16x16xf32>, vector<16x8xf32>, vector<16x8xf32> -> vector<16x8xf32>
    %68 = tpu.reciprocal %65 : vector<16x1xf32> -> vector<16x1xf32>
    %69 = vector.broadcast %68 : vector<16x1xf32> to vector<16x8xf32>
    %70 = arith.mulf %67, %69 : vector<16x8xf32>
    %71 = tpu.concatenate %45, %70 in 1 : vector<16x8xf32>, vector<16x8xf32> -> vector<16x16xf32>
    %72 = vector.broadcast %11 : vector<1x16xf32> to vector<16x16xf32>
    %73 = arith.addf %71, %72 : vector<16x16xf32>
    %cst_23 = arith.constant 0.000000e+00 : f32
    %74 = vector.broadcast %cst_23 : f32 to vector<16x16xf32>
    %75 = arith.cmpf ogt, %73, %74 : vector<16x16xf32>
    %cst_24 = arith.constant 0.000000e+00 : f32
    %76 = vector.broadcast %cst_24 : f32 to vector<16x16xf32>
    %77 = arith.minimumf %73, %76 : vector<16x16xf32>
    %78 = math.exp %77 : vector<16x16xf32>
    %cst_25 = arith.constant 1.000000e+00 : f32
    %79 = vector.broadcast %cst_25 : f32 to vector<16x16xf32>
    %80 = arith.subf %78, %79 : vector<16x16xf32>
    %81 = arith.select %75, %73, %80 : vector<16x16xi1>, vector<16x16xf32>
    %cst_26 = arith.constant dense<0.000000e+00> : vector<16x4xf32>
    %82 = tpu.matmul %81, %14, %cst_26 {dimension_numbers = #tpu.dot_dimension_numbers<[1], [0], [0], [1], [0, 0, 1, 1], [], []>} : vector<16x16xf32>, vector<16x4xf32>, vector<16x4xf32> -> vector<16x4xf32>
    %cst_27 = arith.constant dense<0.000000e+00> : vector<16x1xf32>
    %83 = tpu.matmul %82, %16, %cst_27 {dimension_numbers = #tpu.dot_dimension_numbers<[1], [0], [0], [1], [0, 0, 1, 1], [], []>} : vector<16x4xf32>, vector<4x1xf32>, vector<16x1xf32> -> vector<16x1xf32>
    %cst_28 = arith.constant dense<0.000000e+00> : vector<1x16xf32>
    %84 = tpu.matmul %15, %82, %cst_28 {dimension_numbers = #tpu.dot_dimension_numbers<[1], [1], [0], [0], [0, 0, 1, 0], [], []>} : vector<1x4xf32>, vector<16x4xf32>, vector<1x16xf32> -> vector<1x16xf32>
    %85 = vector.broadcast %83 : vector<16x1xf32> to vector<16x16xf32>
    %86 = vector.broadcast %84 : vector<1x16xf32> to vector<16x16xf32>
    %87 = arith.addf %85, %86 : vector<16x16xf32>
    %cst_29 = arith.constant 0.000000e+00 : f32
    %88 = vector.broadcast %cst_29 : f32 to vector<16x16xf32>
    %89 = arith.cmpf ogt, %87, %88 : vector<16x16xf32>
    %cst_30 = arith.constant 2.000000e-01 : f32
    %90 = vector.broadcast %cst_30 : f32 to vector<16x16xf32>
    %91 = arith.mulf %90, %87 : vector<16x16xf32>
    %92 = arith.select %89, %87, %91 : vector<16x16xi1>, vector<16x16xf32>
    %93 = arith.addf %92, %9 : vector<16x16xf32>
    %cst_31 = arith.constant dense<0xFF800000> : vector<16xf32>
    %94 = vector.multi_reduction <maximumf>, %93, %cst_31 [1] : vector<16x16xf32> to vector<16xf32>
    %95 = vector.shape_cast %94 : vector<16xf32> to vector<16x1xf32>
    %96 = vector.broadcast %95 : vector<16x1xf32> to vector<16x16xf32>
    %97 = arith.subf %93, %96 : vector<16x16xf32>
    %98 = math.exp %97 : vector<16x16xf32>
    %cst_32 = arith.constant dense<0.000000e+00> : vector<16xf32>
    %99 = vector.multi_reduction <add>, %98, %cst_32 [1] : vector<16x16xf32> to vector<16xf32>
    %100 = vector.shape_cast %99 : vector<16xf32> to vector<16x1xf32>
    %cst_33 = arith.constant 9.99999968E-21 : f32
    %101 = vector.broadcast %cst_33 : f32 to vector<16x1xf32>
    %102 = arith.maximumf %100, %101 : vector<16x1xf32>
    %cst_34 = arith.constant dense<0.000000e+00> : vector<16x4xf32>
    %103 = tpu.matmul %98, %82, %cst_34 {dimension_numbers = #tpu.dot_dimension_numbers<[1], [0], [0], [1], [0, 0, 1, 1], [], []>} : vector<16x16xf32>, vector<16x4xf32>, vector<16x4xf32> -> vector<16x4xf32>
    %104 = tpu.reciprocal %102 : vector<16x1xf32> -> vector<16x1xf32>
    %105 = vector.broadcast %104 : vector<16x1xf32> to vector<16x4xf32>
    %106 = arith.mulf %103, %105 : vector<16x4xf32>
    %107 = vector.broadcast %17 : vector<1x4xf32> to vector<16x4xf32>
    %108 = arith.addf %106, %107 : vector<16x4xf32>
    %c0_35 = arith.constant 0 : index
    %c0_36 = arith.constant 0 : index
    %c0_37 = arith.constant 0 : index
    %109 = vector.load %arg3[%c0_35, %c0_36, %c0_37] : memref<1x16x4xf32, #tpu.memory_space<vmem>>, vector<1x16x4xf32>
    %110 = vector.shape_cast %109 : vector<1x16x4xf32> to vector<16x4xf32>
    %111 = vector.shape_cast %108 : vector<16x4xf32> to vector<1x16x4xf32>
    tpu.vector_store %arg3[%c0_35, %c0_36, %c0_37], %111 {strides = array<i32>} : memref<1x16x4xf32, #tpu.memory_space<vmem>>, vector<1x16x4xf32>,
    return
  }
  func.func @transform_0(%arg0: i32) -> (i32, i32) {
    %c0_i32 = arith.constant 0 : i32
    %c0_i32_0 = arith.constant 0 : i32
    %c0_i32_1 = arith.constant 0 : i32
    return %c0_i32, %c0_i32_0 : i32, i32
  }
  func.func @transform_1(%arg0: i32) -> (i32, i32, i32) {
    %c0_i32 = arith.constant 0 : i32
    %c0_i32_0 = arith.constant 0 : i32
    %c0_i32_1 = arith.constant 0 : i32
    return %arg0, %c0_i32, %c0_i32_0 : i32, i32, i32
  }
  func.func @transform_2(%arg0: i32) -> (i32, i32, i32) {
    %c0_i32 = arith.constant 0 : i32
    %c0_i32_0 = arith.constant 0 : i32
    %c0_i32_1 = arith.constant 0 : i32
    return %arg0, %c0_i32, %c0_i32_0 : i32, i32, i32
  }
}

</mosaic_0001>

<bundles_post_ra>
// kernel: tpu_custom_call.1
= control target key start
LH: loop header
LB: loop body
LE: loop exit
PB: predicated region body
PF: predicated region fallthrough
CT: control target
= control target key end

     0   :  { %s1365_s9 = smov 0   ;;  %s1489_s0 = inlined_call_operand.vmem [shape: f32[80,16], index: 0, kind: input, shape index: {}]   ;;  %s1490_s1 = inlined_call_operand.vmem [shape: f32[4,32,16], index: 1, kind: input, shape index: {}]   ;;  %s1491_s2 = inlined_call_operand.vmem [shape: f32[4,16,4], index: 2, kind: output, shape index: {}]  }
   0x1 LB: > { %s1126_s10 = sadd.s32 4294967295, %s1340_s9   ;;  %p1130_p0 = scmp.ge.s32.totalorder %s1340_s9, 1  ;;  %s1340_s9 = sphi %s1365_s9, %s12_s9  }
   0x2   : > { %p112_p1 = scmp.lt.s32.totalorder %s1340_s9, 5 }
   0x4   : > { %p113_p2 = pnand %p1130_p0, %p112_p1 }
   0x5   : > { %v144_v0 = vld [vmem:[%s1489_s0] sm:$0xff] (!%p113_p2)  ;;  %vm169_vm0 = vcmask (!%p113_p2), 1044480   ;;  %p134_p3 = scmp.lt.s32.totalorder (!%p113_p2), %s1126_s10, 3  ;;  %v147_v1 = vld [vmem:[%s1489_s0 + $0x18] sm:$0xff] (!%p113_p2)  ;;  %vm162_vm1 = vcmask (!%p113_p2), 39936   ;;  %v1342_v6 = vmov (!%p113_p2), 0.0|0.0   ;;  %v413_v19 = vlaneseq (!%p113_p2) }
   0x6   : > { %116 = sbr.rel (%p113_p2) target bundleno = 2040 (0x7f8), region = 28  ;;  %v148_v2 = vld [vmem:[%s1489_s0 + $0x20] sm:$0xff] (!%p113_p2)  ;;  %1195 = vmatprep.subr.msk.mxu0 (!%p113_p2), %vm169_vm0, %v144_v0  ;;  %vm1343_vm2 = vmmov (!%p113_p2), 0   ;;  %v1344_v7 = vmov (!%p113_p2), 0.0   ;;  %vm248_vm3 = vcmask (!%p113_p2), 130048   ;;  %v146_v12 = vld [vmem:[%s1489_s0 + $0x10] sm:$0xff] (!%p113_p2) }
   0x7   : > { %v1254_v3 = vpack.c.bf16 (!%p113_p2), %v148_v2, %v147_v1  ;;  %1196 = vmatpush3.msk.msra.mxu0 (!%p113_p2), %vm169_vm0, %v144_v0  ;;  %vm1260_vm4 = vmpackc.low (!%p113_p2), %vm248_vm3, %vm248_vm3  ;;  %v1345_v13 = vmov (!%p113_p2), 1   ;;  %v1346_v14 = vmov (!%p113_p2), 0   ;;  %v414_v20 = vshrl.u32 (!%p113_p2), %v413_v19, 7  ;;  %s1348_s23 = smov (!%p113_p2), 120   ;;  %s1349_s28 = smov (!%p113_p2), 8  }
   0x8   : > { %1258 = vmatprep.subr.bf16.mxu0 (!%p113_p2), %v1342_v6  ;;  %1299 = vset.pattern.permute.xlu1 (!%p113_p2), %v1345_v13  ;;  %v1347_v31 = vmov (!%p113_p2), -1e+30   ;;  %vm782_vm11 = vcmask (!%p113_p2), 1043456   ;;  %vm673_vm12 = vcmask (!%p113_p2), 64512   ;;  %vm775_vm15 = vcmask (!%p113_p2), 31744  }
   0x9   : > { %1255 = vmatprep.subr.bf16.mxu1 (!%p113_p2), %v1254_v3  ;;  %1298 = vset.pattern.permute.xlu0 (!%p113_p2), %v1346_v14  ;;  %v1413_v21 = vsub.s32 (!%p113_p2), 0, %v414_v20  ;;  %v542_v22 = vsub.s32 (!%p113_p2), 1, %v414_v20  ;;  %vm1276_vm0 = vmpackc.low (!%p113_p2), %vm775_vm15, %vm775_vm15 }
   0xa   : > { %1257 = vmatpush3.bf16.msra.mxu1 (!%p113_p2), %v1254_v3 }
   0xd   : > { %s1493_s10 = smov (!%p134_p3, %s1126_s10), 3 }
   0xe   : > { %s1161_s17 = sshll.u32 %s1493_s10, 5  ;;  %s1162_s11 = sshll.u32 %s1493_s10, 4 }
   0xf   : > { %s1388_s20 = scalar_lea.vmem %s1490_s1, %s1161_s17  ;;  %s143_s14 = scalar_lea.vmem %s1491_s2, %s1162_s11 }
  0x10   : > { %v154_v4 = vld [vmem:[%s1388_s20] sm:$0xff]  ;;  %v155_v5 = vld [vmem:[%s1388_s20 + $0x8] sm:$0xff]  ;;  %v156_v23 = vld [vmem:[%s1388_s20 + $0x10] sm:$0xff] }
  0x11   : > { %1197 = vmatprep.mubr.msk.f32.mxu0 %vm162_vm1, %v154_v4  ;;  %vm158_vm5 = vcmp.gt.f32.partialorder %v156_v23, 0.0  ;;  %v157_v26 = vld [vmem:[%s1388_s20 + $0x18] sm:$0xff]  ;;  %v149_v23 = vld [vmem:[%s1489_s0 + $0x28] sm:$0xff] }
  0x12   : > { %1198 = vmatmul.mubr.msk.f32.vlgmr.msra.gmra.mrb[0].mxu0 %vm162_vm1, %v155_v5  ;;  %v1418_v32 = vsel %vm158_vm5, 0.0, %v1347_v31  ;;  %vm159_vm6 = vcmp.gt.f32.partialorder %v157_v26, 0.0 }
  0x13   : > { %1211 = vmatprep.mubr.msk.f32.mxu0 %vm1343_vm2, %v1344_v7  ;;  %v1421_v42 = vsel %vm159_vm6, 0.0, %v1347_v31 }
  0xe5   : > { %v1395_v8 = vpop.f32.mrb[0].mxu0 }
  0xe6   : > { %v1397_v9 = vpop.f32.mrb[1].mxu0 }
  0xe7   : > { %v1300_v10 = vpack.i.bf16 %v1395_v8, %v1397_v9  ;;  %v1259_v11 = vpack.c.bf16 %v1395_v8, %v1397_v9  ;;  %1204 = vmatprep.mubr.msk.f32.mxu1 %vm248_vm3, %v1397_v9 }
  0xe8   : > { %1205 = vmatmul.mubr.msk.f32.vlgmr.msra.gmra.mrb[0].mxu1 %vm248_vm3, %v1395_v8 }
  0xe9   : > { %1261 = vmatpush3.bf16.xpose.msk.msra.mxu0 %vm1260_vm4, %v1259_v11  ;;  %1263 = vmatprep.subr.bf16.mxu1 %v1259_v11 }
  0xea   : > { %1265 = vmatpush3.bf16.msra.mxu1 %v1259_v11 }
  0xf0   : > { %1212 = vmatmul.mubr.msk.f32.vlgmr.msra.gmra.mrb[2].mxu0 %vm248_vm3, %v146_v12 }
 0x1bb   : > { %v1206_v15 = vpop.f32.mrb[0].mxu1 }
 0x1bc   : > { %v321_v16 = vpop.f32.mrb[1].mxu1 }
 0x1bd   : > { %533 = vperm.xlu1 %1299, %v321_v16   ;;  %405 = vperm.xlu0 %1298, %v321_v16  }
 0x1c1   : > { %537 = vperm.xlu1 %1299, %v1206_v15   ;;  %410 = vperm.xlu0 %1298, %v1206_v15  }
 0x1c3   : > { %v399_v17 = vpop.f32.mrb[2].mxu0 }
 0x1c4   : > { %v1213_v18 = vpop.f32.mrb[3].mxu0  ;;  %v416_v24 = vrot.slane %v399_v17, %v1413_v21  ;;  %v543_v25 = vrot.slane %v399_v17, %v542_v22 }
 0x1c5   : > { %1305 = vset.pattern.permute.xlu1 %v1346_v14 }
 0x23c   : > { %v534_v27 = vpop.permute.xlu1 %533  ;;  %v406_v28 = vpop.permute.xlu0 %405 }
 0x23d   : > { %v544_v29 = vadd.f32 %v543_v25, %v534_v27  ;;  %v417_v30 = vadd.f32 %v416_v24, %v406_v28 }
 0x23f   : > { %vm546_vm7 = vcmp.gt.f32.partialorder %v544_v29, 0.0  ;;  %v548_v33 = vmul.f32 0.2, %v544_v29  ;;  %vm419_vm8 = vcmp.gt.f32.partialorder %v417_v30, 0.0  ;;  %v421_v34 = vmul.f32 0.2, %v417_v30 }
 0x240   : > { %v538_v35 = vpop.permute.xlu1 %537  ;;  %v411_v36 = vpop.permute.xlu0 %410 }
 0x241   : > { %v545_v37 = vadd.f32 %v543_v25, %v538_v35  ;;  %v418_v38 = vadd.f32 %v416_v24, %v411_v36  ;;  %v423_v39 = vsel %vm419_vm8, %v417_v30, %v421_v34  ;;  %v550_v40 = vsel %vm546_vm7, %v544_v29, %v548_v33  ;;  %v150_v24 = vld [vmem:[%s1489_s0 + $0x30] sm:$0xff]  ;;  %v152_v33 = vld [vmem:[%s1489_s0 + $0x40] sm:$0xff] }
 0x242   : > { %v425_v41 = vadd.f32 %v423_v39, %v1418_v32  ;;  %v552_v46 = vadd.f32 %v550_v40, %v1418_v32  ;;  %v1270_v25 = vpack.c.bf16 %v150_v24, %v149_v23 }
 0x243   : > { %vm547_vm9 = vcmp.gt.f32.partialorder %v545_v37, 0.0  ;;  %v549_v43 = vmul.f32 0.2, %v545_v37  ;;  %vm420_vm10 = vcmp.gt.f32.partialorder %v418_v38, 0.0  ;;  %v422_v44 = vmul.f32 0.2, %v418_v38 }
 0x244   : > { %v427_v45 = vsel %vm248_vm3, %v425_v41, -inf  ;;  %v554_v50 = vsel %vm248_vm3, %v552_v46, -inf  ;;  %1271 = vmatprep.subr.bf16.mxu0 %v1270_v25 }
 0x245   : > { %428 = vmax.xlane.f32.xlu0 %v427_v45  ;;  %v424_v47 = vsel %vm420_vm10, %v418_v38, %v422_v44  ;;  %v551_v48 = vsel %vm547_vm9, %v545_v37, %v549_v43  ;;  %1273 = vmatpush3.bf16.msra.mxu0 %v1270_v25  ;;  %v145_v38 = vld [vmem:[%s1489_s0 + $0x8] sm:$0xff] }
 0x246   : > { %v426_v49 = vadd.f32 %v424_v47, %v1421_v42  ;;  %v553_v52 = vadd.f32 %v551_v48, %v1421_v42  ;;  %1274 = vmatprep.subr.bf16.mxu0 %v1342_v6  ;;  %v679_v6 = vrot.slane %v145_v38, %v1413_v21 }
 0x248   : > { %v430_v51 = vsel %vm248_vm3, %v426_v49, -inf  ;;  %v557_v53 = vsel %vm248_vm3, %v553_v52, -inf }
 0x249   : > { %555 = vmax.xlane.f32.xlu0 %v554_v50  ;;  %431 = vmax.xlane.f32.xlu1 %v430_v51 }
 0x24d   : > { %558 = vmax.xlane.f32.xlu0 %v557_v53 }
 0x25a   : > { %1301 = vrot.lane.b32.xlu1 %v1300_v10, %s1348_s23 }
 0x2d2   : > { %v429_v54 = vpop.xlane.xlu0 %428 }
 0x2d3   : > { %v433_v55 = vsub.f32 %v425_v41, %v429_v54 }
 0x2d5   : > { %v435_v56 = vmul.f32 1.442695, %v433_v55 }
 0x2d6   : > { %v432_v57 = vpop.xlane.xlu1 %431  ;;  %v556_v58 = vpop.xlane.xlu0 %555 }
 0x2d7   : > { %1306 = vpow2.f32 %v435_v56  ;;  %v434_v59 = vsub.f32 %v426_v49, %v432_v57  ;;  %v560_v60 = vsub.f32 %v552_v46, %v556_v58 }
 0x2d9   : > { %v437_v61 = vmul.f32 1.442695, %v434_v59  ;;  %v562_v62 = vmul.f32 1.442695, %v560_v60 }
 0x2da   : > { %v1302_v63 = vpop.permute.xlu1 %1301  ;;  %v559_v0 = vpop.xlane.xlu0 %558 }
 0x2db   : > { %1308 = vpow2.f32 %v437_v61  ;;  %v1304_v1 = vunpack.i.h.bf16 %v1302_v63  ;;  %v1303_v2 = vunpack.i.l.bf16 %v1302_v63  ;;  %v561_v3 = vsub.f32 %v553_v52, %v559_v0  ;;  %v151_v63 = vld [vmem:[%s1489_s0 + $0x38] sm:$0xff] }
 0x2dc   : > { %1310 = vpow2.f32 %v562_v62 }
 0x2dd   : > { %v1266_v4 = vpack.c.bf16 %v1304_v1, %v1303_v2  ;;  %v564_v5 = vmul.f32 1.442695, %v561_v3 }
 0x2df   : > { %1312 = vpow2.f32 %v564_v5  ;;  %1267 = vmatprep.subr.bf16.mxu1 %v1266_v4 }
 0x2e1   : > { %v1307_v8 = vpop.eup %1306 }
 0x2e2   : > { %1218 = vmatprep.mubr.msk.f32.mxu1 %vm248_vm3, %v1307_v8  ;;  %v439_v15 = vsel %vm248_vm3, %v1307_v8, 0.0 }
 0x2e5   : > { %v1309_v9 = vpop.eup %1308 }
 0x2e6   : > { %v1311_v10 = vpop.eup %1310  ;;  %1219 = vmatmul.mubr.msk.f32.vlgmr.msra.gmra.mrb[2].mxu1 %vm248_vm3, %v1309_v9  ;;  %v442_v14 = vsel %vm248_vm3, %v1309_v9, 0.0 }
 0x2e7   : > { %1269 = vmatpush3.bf16.msra.mxu1 %v1266_v4  ;;  %1225 = vmatprep.mubr.msk.f32.mxu1 %vm248_vm3, %v1311_v10  ;;  %v566_v11 = vsel %vm248_vm3, %v1311_v10, 0.0 }
 0x2e8   : > { %567 = vadd.xlane.f32.xlu0 %v566_v11  ;;  %1235 = vmatprep.subr.msk.mxu1 %vm782_vm11, %v152_v33 }
 0x2e9   : > { %v1313_v12 = vpop.eup %1312 }
 0x2ea   : > { %1226 = vmatmul.mubr.msk.f32.vlgmr.msra.gmra.mrb[4].mxu1 %vm248_vm3, %v1313_v12  ;;  %v569_v13 = vsel %vm248_vm3, %v1313_v12, 0.0 }
 0x2eb   : > { %1236 = vmatpush3.msk.msra.mxu1 %vm782_vm11, %v152_v33 }
 0x2ec   : > { %570 = vadd.xlane.f32.xlu0 %v569_v13 }
 0x2f0   : > { %443 = vadd.xlane.f32.xlu0 %v442_v14 }
 0x2f4   : > { %440 = vadd.xlane.f32.xlu0 %v439_v15 }
 0x375   : > { %v568_v16 = vpop.xlane.xlu0 %567 }
 0x376   : > { %v572_v19 = vmax.f32 %v568_v16, 1e-20 }
 0x379   : > { %v571_v17 = vpop.xlane.xlu0 %570 }
 0x37a   : > { %v573_v18 = vmax.f32 %v571_v17, 1e-20 }
 0x37c   : > { %1314 = vrcp.f32 %v573_v18 }
 0x37d   : > { %1316 = vrcp.f32 %v572_v19  ;;  %v444_v34 = vpop.xlane.xlu0 %443 }
 0x37e   : > { %v446_v36 = vmax.f32 %v444_v34, 1e-20 }
 0x380   : > { %1318 = vrcp.f32 %v446_v36 }
 0x381   : > { %v441_v35 = vpop.xlane.xlu0 %440 }
 0x382   : > { %v445_v37 = vmax.f32 %v441_v35, 1e-20 }
 0x384   : > { %1320 = vrcp.f32 %v445_v37 }
 0x386   : > { %v1315_v26 = vpop.eup %1314 }
 0x387   : > { %v1317_v28 = vpop.eup %1316 }
 0x38a   : > { %v1319_v39 = vpop.eup %1318 }
 0x38e   : > { %v1321_v40 = vpop.eup %1320 }
 0x3b9   : > { %v1220_v20 = vpop.f32.mrb[2].mxu1 }
 0x3ba   : > { %v519_v22 = vpop.f32.mrb[3].mxu1  ;;  %v531_v41 = vmul.f32 %v1319_v39, %v1220_v20 }
 0x3bb   : > { %v530_v43 = vmul.f32 %v1321_v40, %v519_v22 }
 0x3bd   : > { %v1227_v27 = vpop.f32.mrb[4].mxu1 }
 0x3be   : > { %v664_v29 = vmul.f32 %v1315_v26, %v1227_v27  ;;  %v652_v30 = vpop.f32.mrb[5].mxu1 }
 0x3bf   : > { %v663_v31 = vmul.f32 %v1317_v28, %v652_v30 }
 0x3c0   : > { %669 = vrot.lane.b32.xlu0 %v664_v29, %s1349_s28 }
 0x3c1   : > { %667 = vrot.lane.b32.xlu1 %v663_v31, %s1349_s28  ;;  %v153_v31 = vld [vmem:[%s1489_s0 + $0x48] sm:$0xff] }
 0x3c2   : > { %v1066_v33 = vrot.slane %v153_v31, %v1413_v21 }
 0x432   : > { %v670_v44 = vpop.permute.xlu0 %669 }
 0x433   : > { %v675_v45 = vsel %vm673_vm12, %v531_v41, %v670_v44  ;;  %v668_v46 = vpop.permute.xlu1 %667 }
 0x434   : > { %v681_v47 = vadd.f32 %v679_v6, %v675_v45  ;;  %v674_v48 = vsel %vm673_vm12, %v530_v43, %v668_v46 }
 0x435   : > { %v680_v49 = vadd.f32 %v679_v6, %v674_v48 }
 0x436   : > { %v685_v50 = vmin.f32 %v681_v47, 0.0  ;;  %vm683_vm14 = vcmp.gt.f32.partialorder %v681_v47, 0.0 }
 0x437   : > { %v684_v51 = vmin.f32 %v680_v49, 0.0  ;;  %vm682_vm13 = vcmp.gt.f32.partialorder %v680_v49, 0.0 }
 0x438   : > { %v688_v52 = vmul.f32 1.442695, %v685_v50 }
 0x439   : > { %v686_v53 = vmul.f32 1.442695, %v684_v51 }
 0x43a   : > { %1322 = vpow2.f32 %v688_v52 }
 0x43b   : > { %1324 = vpow2.f32 %v686_v53 }
 0x444   : > { %v1323_v54 = vpop.eup %1322 }
 0x445   : > { %v1325_v55 = vpop.eup %1324  ;;  %v1148_v56 = vadd.f32 -1.0, %v1323_v54 }
 0x446   : > { %v1147_v57 = vadd.f32 -1.0, %v1325_v55 }
 0x447   : > { %v693_v59 = vsel %vm683_vm14, %v681_v47, %v1148_v56 }
 0x448   : > { %v692_v58 = vsel %vm682_vm13, %v680_v49, %v1147_v57 }
 0x449   : > { %1232 = vmatprep.mubr.msk.f32.mxu0 %vm248_vm3, %v692_v58 }
 0x44a   : > { %1233 = vmatmul.mubr.msk.f32.vlgmr.msra.gmra.mrb[4].mxu0 %vm248_vm3, %v693_v59 }
 0x44b   : > { %1244 = vmatprep.mubr.msk.f32.mxu0 %vm1343_vm2, %v1344_v7 }
 0x51d   : > { %v1234_v60 = vpop.f32.mrb[4].mxu0 }
 0x51e   : > { %v766_v61 = vpop.f32.mrb[5].mxu0 }
 0x51f   : > { %v1275_v62 = vpack.c.bf16 %v1234_v60, %v766_v61  ;;  %1237 = vmatprep.mubr.msk.f32.mxu1 %vm775_vm15, %v766_v61 }
 0x520   : > { %1238 = vmatmul.mubr.msk.f32.vlgmr.msra.gmra.mrb[6].mxu1 %vm775_vm15, %v1234_v60 }
 0x521   : > { %1277 = vmatpush3.bf16.xpose.msk.msra.mxu0 %vm1276_vm0, %v1275_v62  ;;  %1279 = vmatprep.subr.bf16.mxu1 %v1275_v62 }
 0x522   : > { %1281 = vmatpush3.bf16.msra.mxu1 %v1275_v62 }
 0x528   : > { %1245 = vmatmul.mubr.msk.f32.vlgmr.msra.gmra.mrb[6].mxu0 %vm775_vm15, %v151_v63 }
 0x5f3   : > { %v1239_v7 = vpop.f32.mrb[6].mxu1 }
 0x5f4   : > { %v852_v0 = vpop.f32.mrb[7].mxu1 }
 0x5f5   : > { %936 = vperm.xlu1 %1305, %v852_v0  }
 0x5f9   : > { %941 = vperm.xlu1 %1305, %v1239_v7  }
 0x5fb   : > { %v930_v1 = vpop.f32.mrb[6].mxu0 }
 0x5fc   : > { %v1246_v2 = vpop.f32.mrb[7].mxu0  ;;  %v947_v3 = vrot.slane %v930_v1, %v1413_v21 }
 0x674   : > { %v937_v4 = vpop.permute.xlu1 %936 }
 0x675   : > { %v948_v5 = vadd.f32 %v947_v3, %v937_v4 }
 0x677   : > { %vm950_vm1 = vcmp.gt.f32.partialorder %v948_v5, 0.0  ;;  %v952_v8 = vmul.f32 0.2, %v948_v5 }
 0x678   : > { %v942_v9 = vpop.permute.xlu1 %941 }
 0x679   : > { %v949_v10 = vadd.f32 %v947_v3, %v942_v9  ;;  %v954_v11 = vsel %vm950_vm1, %v948_v5, %v952_v8 }
 0x67a   : > { %v956_v12 = vadd.f32 %v954_v11, %v1418_v32 }
 0x67b   : > { %vm951_vm2 = vcmp.gt.f32.partialorder %v949_v10, 0.0  ;;  %v953_v13 = vmul.f32 0.2, %v949_v10 }
 0x67c   : > { %v958_v14 = vsel %vm248_vm3, %v956_v12, -inf }
 0x67d   : > { %959 = vmax.xlane.f32.xlu1 %v958_v14  ;;  %v955_v15 = vsel %vm951_vm2, %v949_v10, %v953_v13 }
 0x67e   : > { %v957_v16 = vadd.f32 %v955_v15, %v1421_v42 }
 0x680   : > { %v961_v17 = vsel %vm248_vm3, %v957_v16, -inf }
 0x681   : > { %962 = vmax.xlane.f32.xlu0 %v961_v17 }
 0x70a   : > { %v960_v18 = vpop.xlane.xlu1 %959 }
 0x70b   : > { %v964_v19 = vsub.f32 %v956_v12, %v960_v18 }
 0x70d   : > { %v966_v20 = vmul.f32 1.442695, %v964_v19 }
 0x70e   : > { %v963_v22 = vpop.xlane.xlu0 %962 }
 0x70f   : > { %1326 = vpow2.f32 %v966_v20  ;;  %v965_v23 = vsub.f32 %v957_v16, %v963_v22 }
 0x711   : > { %v968_v24 = vmul.f32 1.442695, %v965_v23 }
 0x713   : > { %1328 = vpow2.f32 %v968_v24 }
 0x719   : > { %v1327_v32 = vpop.eup %1326 }
 0x71a   : > { %1251 = vmatprep.mubr.msk.f32.mxu1 %vm248_vm3, %v1327_v32  ;;  %v970_v25 = vsel %vm248_vm3, %v1327_v32, 0.0 }
 0x71b   : > { %971 = vadd.xlane.f32.xlu1 %v970_v25 }
 0x71d   : > { %v1329_v26 = vpop.eup %1328 }
 0x71e   : > { %1252 = vmatmul.mubr.msk.f32.vlgmr.msra.gmra.mrb[8].mxu1 %vm248_vm3, %v1329_v26  ;;  %v973_v42 = vsel %vm248_vm3, %v1329_v26, 0.0 }
 0x71f   : > { %974 = vadd.xlane.f32.xlu1 %v973_v42 }
 0x7a8   : > { %v972_v27 = vpop.xlane.xlu1 %971 }
 0x7a9   : > { %v976_v30 = vmax.f32 %v972_v27, 1e-20 }
 0x7ac   : > { %v975_v28 = vpop.xlane.xlu1 %974 }
 0x7ad   : > { %v977_v29 = vmax.f32 %v975_v28, 1e-20 }
 0x7af   : > { %1330 = vrcp.f32 %v977_v29 }
 0x7b0   : > { %1332 = vrcp.f32 %v976_v30 }
 0x7b9   : > { %v1331_v34 = vpop.eup %1330 }
 0x7ba   : > { %v1333_v36 = vpop.eup %1332 }
 0x7f1   : > { %v1253_v35 = vpop.f32.mrb[8].mxu1 }
 0x7f2   : > { %v1062_v37 = vmul.f32 %v1331_v34, %v1253_v35  ;;  %v1050_v38 = vpop.f32.mrb[9].mxu1 }
 0x7f3   : > { %v1061_v39 = vmul.f32 %v1333_v36, %v1050_v38 }
 0x7f4   : > { %v1068_v6 = vadd.f32 %v1066_v33, %v1062_v37 }
 0x7f5   : > { %v1067_v40 = vadd.f32 %v1066_v33, %v1061_v39 }
 0x7f6   : > { %1070 = vst.msk [vmem:[%s143_s14 + $0x8] sm:$0xff] %vm775_vm15, %v1068_v6 }
 0x7f7   : > { %1069 = vst.msk [vmem:[%s143_s14] sm:$0xff] %vm775_vm15, %v1067_v40 }
 0x7f8 PF: > { %s12_s9 = sadd.s32 1, %s1340_s9  }
 0x7f9   : > { %p9_p4 = scmp.ge.s32.totalorder %s12_s9, 6  }
 0x7fb   :  { %11 = sbr.rel (!%p9_p4) target bundleno = 1 (0x1), region = 58 }

</bundles_post_ra>
